<compile_context>
chip_gen: v7x
topology: tpu7x:2x2x1
jax: 0.10.0
libtpu: 0.0.40
codegen_flags: <defaults>
</compile_context>

<pallas_src>
import functools

import jax
import jax.numpy as jnp
from jax import lax
from jax.experimental import pallas as pl
from jax.experimental.pallas import tpu as pltpu


def _edge_weighted_loss_kernel(pred_ref, gt_ref, out_ref, *, mode, H, W):
    """Per-sample kernel.

    pred_ref / gt_ref : (H, W) block (one sample, original dtype).
    out_ref           : (1, 1) f32 resident accumulator:
                        sum_b  sum(|pred_edge - gt_edge| * gt_edge) / (max_b(gt_edge) + 1e-6).
    """
    b = pl.program_id(0)

    @pl.when(b == 0)
    def _init():
        out_ref[...] = jnp.zeros_like(out_ref)

    x = pred_ref[...].astype(jnp.float32)   # (H, W), upcast in VMEM, not in HBM
    y = gt_ref[...].astype(jnp.float32)

    row = lax.broadcasted_iota(jnp.int32, (H, W), 0)
    col = lax.broadcasted_iota(jnp.int32, (H, W), 1)

    def shift(a, amt, axis):
        """Zero-padded shift: out[p] = a[p - amt] along `axis`, 0 where out of range."""
        n = H if axis == 0 else W
        idx = row if axis == 0 else col
        r = pltpu.roll(a, shift=amt % n, axis=axis)      # positive static rotate (XLU)
        mask = (idx >= amt) if amt > 0 else (idx < n + amt)
        return jnp.where(mask, r, 0.0)

    def edge(a):
        up = shift(a, 1, 0)       # a[h-1, w]   (zero row above the top)
        dn = shift(a, -1, 0)      # a[h+1, w]
        if mode == 'laplacian':
            lf = shift(a, 1, 1)   # a[h, w-1]
            rt = shift(a, -1, 1)  # a[h, w+1]
            return jnp.abs(up + dn + lf + rt - 4.0 * a)
        # Sobel, separable form: [1,2,1] smooth x [-1,0,1] diff.
        t = up + 2.0 * a + dn                         # vertical smooth   (H, W)
        gx = shift(t, -1, 1) - shift(t, 1, 1)         # t[h,w+1] - t[h,w-1]
        lf = shift(a, 1, 1)
        rt = shift(a, -1, 1)
        s = lf + 2.0 * a + rt                         # horizontal smooth (H, W)
        gy = shift(s, -1, 0) - shift(s, 1, 0)         # s[h+1,w] - s[h-1,w]
        return jnp.sqrt(gx * gx + gy * gy + 1e-6)

    pred_edge = edge(x)   # (H, W) f32
    gt_edge = edge(y)     # (H, W) f32

    # per-sample max of gt_edge (lane reduce, then sublane reduce) -> (1, 1)
    m = jnp.max(gt_edge, axis=1, keepdims=True)
    m = jnp.max(m, axis=0, keepdims=True)

    # hoisted normalisation: sum the un-normalised weighted L1, divide the scalar once
    num = jnp.abs(pred_edge - gt_edge) * gt_edge      # (H, W)
    acc = jnp.sum(num, axis=1, keepdims=True)         # (H, 1)
    acc = jnp.sum(acc, axis=0, keepdims=True)         # (1, 1)

    out_ref[...] += acc / (m + 1e-6)


def edge_weighted_loss(logits, gt_mask, mode='laplacian'):
    """Pallas port of EdgeWeightedLoss.forward. logits/gt_mask: (B, 1, H, W)."""
    assert mode in ('sobel', 'laplacian')
    B, C, H, W = logits.shape
    assert C == 1, 'EdgeWeightedLoss only supports single-channel output'

    # Channel squeeze is metadata-only; the f32 upcast happens inside the kernel.
    x = logits.reshape(B, H, W)
    y = gt_mask.reshape(B, H, W)

    kernel = functools.partial(_edge_weighted_loss_kernel, mode=mode, H=H, W=W)

    # Derive the VMEM budget: 2-deep pipelined input blocks + ~14 live full-size
    # f32 stencil temporaries + slack; clamp to v7x's 64 MiB physical VMEM.
    in_bytes = x.dtype.itemsize + y.dtype.itemsize
    vmem_est = 2 * H * W * in_bytes + 14 * H * W * 4 + (2 << 20)
    vmem_limit = int(min(64 << 20, max(32 << 20, vmem_est)))

    total = pl.pallas_call(
        kernel,
        grid=(B,),
        in_specs=[
            pl.BlockSpec((None, H, W), lambda b: (b, 0, 0)),
            pl.BlockSpec((None, H, W), lambda b: (b, 0, 0)),
        ],
        # Resident accumulator: constant index_map, one write-back at the end.
        out_specs=pl.BlockSpec((1, 1), lambda b: (0, 0)),
        out_shape=jax.ShapeDtypeStruct((1, 1), jnp.float32),
        compiler_params=pltpu.CompilerParams(
            dimension_semantics=("arbitrary",),   # B is a reduction into out_ref
            vmem_limit_bytes=vmem_limit,
        ),
    )(x, y)

    # total = sum_b  sum_{h,w} |pred_edge - gt_edge| * gt_edge / (max_b + 1e-6)
    # final mean over B*C*H*W elements (C == 1).
    return total[0, 0] / (B * H * W)


# ---------------- pure-JAX reference (for correctness check) ----------------
_LAPLACIAN_K = jnp.array([[0., 1., 0.], [1., -4., 1.], [0., 1., 0.]],
                         dtype=jnp.float32).reshape(1, 1, 3, 3)
_SOBEL_KX = jnp.array([[-1., 0., 1.], [-2., 0., 2.], [-1., 0., 1.]],
                      dtype=jnp.float32).reshape(1, 1, 3, 3)
_SOBEL_KY = jnp.array([[-1., -2., -1.], [0., 0., 0.], [1., 2., 1.]],
                      dtype=jnp.float32).reshape(1, 1, 3, 3)


def _edge_detect_ref(x, mode):
    x = x.astype(jnp.float32)
    if mode == 'sobel':
        gx = lax.conv(x, _SOBEL_KX, (1, 1), 'SAME')
        gy = lax.conv(x, _SOBEL_KY, (1, 1), 'SAME')
        return jnp.sqrt(gx ** 2 + gy ** 2 + 1e-6)
    return jnp.abs(lax.conv(x, _LAPLACIAN_K, (1, 1), 'SAME'))


def edge_weighted_loss_ref(logits, gt_mask, mode='laplacian'):
    B = logits.shape[0]
    pred_edge = _edge_detect_ref(logits, mode)
    gt_edge = _edge_detect_ref(gt_mask, mode)
    max_per_sample = gt_edge.reshape(B, -1).max(axis=1).reshape(B, 1, 1, 1) + 1e-6
    weight_map = gt_edge / max_per_sample
    loss = jnp.abs(pred_edge - gt_edge)
    return (loss * weight_map).mean()


if __name__ == "__main__":
    key = jax.random.PRNGKey(0)
    k1, k2 = jax.random.split(key)
    # Small, lane-dense spatial shape (W = 128 fills the vreg lane dim).
    B, C, H, W = 2, 1, 16, 128
    logits = jax.random.normal(k1, (B, C, H, W), dtype=jnp.float32)
    gt_mask = (jax.random.uniform(k2, (B, C, H, W)) > 0.5).astype(jnp.float32)

    for mode in ('laplacian', 'sobel'):
        out = jax.block_until_ready(edge_weighted_loss(logits, gt_mask, mode=mode))
        ref = edge_weighted_loss_ref(logits, gt_mask, mode=mode)
        if not jnp.allclose(out, ref, atol=1e-5, rtol=1e-5):
            raise AssertionError(f"mode={mode}: pallas={out} ref={ref}")

    # Narrow-dtype path: bf16 logits stay bf16 at the pallas_call boundary.
    logits_bf16 = logits.astype(jnp.bfloat16)
    out = jax.block_until_ready(edge_weighted_loss(logits_bf16, gt_mask, mode='laplacian'))
    ref = edge_weighted_loss_ref(logits_bf16, gt_mask, mode='laplacian')
    if not jnp.allclose(out, ref, atol=1e-5, rtol=1e-5):
        raise AssertionError(f"bf16: pallas={out} ref={ref}")

    print("KERNEL_OK")
</pallas_src>

<mosaic_0001>
module attributes {stable_mosaic.version = 11 : i64} {
  func.func @_edge_weighted_loss_kernel(%arg0: i32, %arg1: memref<1x16x128xf32, #tpu.memory_space<vmem>>, %arg2: memref<1x16x128xf32, #tpu.memory_space<vmem>>, %arg3: memref<1x1xf32, #tpu.memory_space<vmem>>) attributes {dimension_semantics = [#tpu.dimension_semantics<arbitrary>], iteration_bounds = array<i64: 2>, scalar_prefetch = 0 : i64, scratch_operands = 0 : i64, tpu.core_type = #tpu.core_type<tc>, window_params = [{transform_indices = @transform_0, window_bounds = array<i64: 1, 16, 128>}, {transform_indices = @transform_1, window_bounds = array<i64: 1, 16, 128>}, {pipeline_mode = #tpu.pipeline_mode<synchronous>, transform_indices = @transform_2, window_bounds = array<i64: 1, 1>}]} {
    %c0_i32 = arith.constant 0 : i32
    %0 = arith.cmpi eq, %arg0, %c0_i32 : i32
    %1 = arith.extui %0 : i1 to i32
    %c0_i32_0 = arith.constant 0 : i32
    %2 = arith.cmpi ne, %1, %c0_i32_0 : i32
    scf.if %2 {
      %cst_37 = arith.constant 0.000000e+00 : f32
      %80 = vector.broadcast %cst_37 : f32 to vector<1x1xf32>
      %c0_38 = arith.constant 0 : index
      %c0_39 = arith.constant 0 : index
      %81 = vector.load %arg3[%c0_38, %c0_39] : memref<1x1xf32, #tpu.memory_space<vmem>>, vector<1x1xf32>
      tpu.vector_store %arg3[%c0_38, %c0_39], %80 {strides = array<i32>} : memref<1x1xf32, #tpu.memory_space<vmem>>, vector<1x1xf32>,
    } else {
    }
    %c0 = arith.constant 0 : index
    %c0_1 = arith.constant 0 : index
    %c0_2 = arith.constant 0 : index
    %3 = vector.load %arg1[%c0, %c0_1, %c0_2] : memref<1x16x128xf32, #tpu.memory_space<vmem>>, vector<1x16x128xf32>
    %4 = vector.shape_cast %3 : vector<1x16x128xf32> to vector<16x128xf32>
    %c0_3 = arith.constant 0 : index
    %c0_4 = arith.constant 0 : index
    %c0_5 = arith.constant 0 : index
    %5 = vector.load %arg2[%c0_3, %c0_4, %c0_5] : memref<1x16x128xf32, #tpu.memory_space<vmem>>, vector<1x16x128xf32>
    %6 = vector.shape_cast %5 : vector<1x16x128xf32> to vector<16x128xf32>
    %7 = tpu.iota {dimensions = array<i32: 0>} : vector<16x128xi32>
    %8 = tpu.iota {dimensions = array<i32: 1>} : vector<16x128xi32>
    %c1_i32 = arith.constant 1 : i32
    %9 = tpu.dynamic_rotate %4 by %c1_i32 dim 0 : vector<16x128xf32>, i32 -> vector<16x128xf32>
    %c1_i32_6 = arith.constant 1 : i32
    %10 = vector.broadcast %c1_i32_6 : i32 to vector<16x128xi32>
    %11 = arith.cmpi sge, %7, %10 : vector<16x128xi32>
    %cst = arith.constant 0.000000e+00 : f32
    %12 = vector.broadcast %cst : f32 to vector<16x128xf32>
    %13 = arith.select %11, %9, %12 : vector<16x128xi1>, vector<16x128xf32>
    %c15_i32 = arith.constant 15 : i32
    %14 = tpu.dynamic_rotate %4 by %c15_i32 dim 0 : vector<16x128xf32>, i32 -> vector<16x128xf32>
    %c15_i32_7 = arith.constant 15 : i32
    %15 = vector.broadcast %c15_i32_7 : i32 to vector<16x128xi32>
    %16 = arith.cmpi slt, %7, %15 : vector<16x128xi32>
    %cst_8 = arith.constant 0.000000e+00 : f32
    %17 = vector.broadcast %cst_8 : f32 to vector<16x128xf32>
    %18 = arith.select %16, %14, %17 : vector<16x128xi1>, vector<16x128xf32>
    %c1_i32_9 = arith.constant 1 : i32
    %19 = tpu.dynamic_rotate %4 by %c1_i32_9 dim 1 : vector<16x128xf32>, i32 -> vector<16x128xf32>
    %c1_i32_10 = arith.constant 1 : i32
    %20 = vector.broadcast %c1_i32_10 : i32 to vector<16x128xi32>
    %21 = arith.cmpi sge, %8, %20 : vector<16x128xi32>
    %cst_11 = arith.constant 0.000000e+00 : f32
    %22 = vector.broadcast %cst_11 : f32 to vector<16x128xf32>
    %23 = arith.select %21, %19, %22 : vector<16x128xi1>, vector<16x128xf32>
    %c127_i32 = arith.constant 127 : i32
    %24 = tpu.dynamic_rotate %4 by %c127_i32 dim 1 : vector<16x128xf32>, i32 -> vector<16x128xf32>
    %c127_i32_12 = arith.constant 127 : i32
    %25 = vector.broadcast %c127_i32_12 : i32 to vector<16x128xi32>
    %26 = arith.cmpi slt, %8, %25 : vector<16x128xi32>
    %cst_13 = arith.constant 0.000000e+00 : f32
    %27 = vector.broadcast %cst_13 : f32 to vector<16x128xf32>
    %28 = arith.select %26, %24, %27 : vector<16x128xi1>, vector<16x128xf32>
    %29 = arith.addf %13, %18 : vector<16x128xf32>
    %30 = arith.addf %29, %23 : vector<16x128xf32>
    %31 = arith.addf %30, %28 : vector<16x128xf32>
    %cst_14 = arith.constant 4.000000e+00 : f32
    %32 = vector.broadcast %cst_14 : f32 to vector<16x128xf32>
    %33 = arith.mulf %32, %4 : vector<16x128xf32>
    %34 = arith.subf %31, %33 : vector<16x128xf32>
    %35 = math.absf %34 : vector<16x128xf32>
    %c1_i32_15 = arith.constant 1 : i32
    %36 = tpu.dynamic_rotate %6 by %c1_i32_15 dim 0 : vector<16x128xf32>, i32 -> vector<16x128xf32>
    %c1_i32_16 = arith.constant 1 : i32
    %37 = vector.broadcast %c1_i32_16 : i32 to vector<16x128xi32>
    %38 = arith.cmpi sge, %7, %37 : vector<16x128xi32>
    %cst_17 = arith.constant 0.000000e+00 : f32
    %39 = vector.broadcast %cst_17 : f32 to vector<16x128xf32>
    %40 = arith.select %38, %36, %39 : vector<16x128xi1>, vector<16x128xf32>
    %c15_i32_18 = arith.constant 15 : i32
    %41 = tpu.dynamic_rotate %6 by %c15_i32_18 dim 0 : vector<16x128xf32>, i32 -> vector<16x128xf32>
    %c15_i32_19 = arith.constant 15 : i32
    %42 = vector.broadcast %c15_i32_19 : i32 to vector<16x128xi32>
    %43 = arith.cmpi slt, %7, %42 : vector<16x128xi32>
    %cst_20 = arith.constant 0.000000e+00 : f32
    %44 = vector.broadcast %cst_20 : f32 to vector<16x128xf32>
    %45 = arith.select %43, %41, %44 : vector<16x128xi1>, vector<16x128xf32>
    %c1_i32_21 = arith.constant 1 : i32
    %46 = tpu.dynamic_rotate %6 by %c1_i32_21 dim 1 : vector<16x128xf32>, i32 -> vector<16x128xf32>
    %c1_i32_22 = arith.constant 1 : i32
    %47 = vector.broadcast %c1_i32_22 : i32 to vector<16x128xi32>
    %48 = arith.cmpi sge, %8, %47 : vector<16x128xi32>
    %cst_23 = arith.constant 0.000000e+00 : f32
    %49 = vector.broadcast %cst_23 : f32 to vector<16x128xf32>
    %50 = arith.select %48, %46, %49 : vector<16x128xi1>, vector<16x128xf32>
    %c127_i32_24 = arith.constant 127 : i32
    %51 = tpu.dynamic_rotate %6 by %c127_i32_24 dim 1 : vector<16x128xf32>, i32 -> vector<16x128xf32>
    %c127_i32_25 = arith.constant 127 : i32
    %52 = vector.broadcast %c127_i32_25 : i32 to vector<16x128xi32>
    %53 = arith.cmpi slt, %8, %52 : vector<16x128xi32>
    %cst_26 = arith.constant 0.000000e+00 : f32
    %54 = vector.broadcast %cst_26 : f32 to vector<16x128xf32>
    %55 = arith.select %53, %51, %54 : vector<16x128xi1>, vector<16x128xf32>
    %56 = arith.addf %40, %45 : vector<16x128xf32>
    %57 = arith.addf %56, %50 : vector<16x128xf32>
    %58 = arith.addf %57, %55 : vector<16x128xf32>
    %cst_27 = arith.constant 4.000000e+00 : f32
    %59 = vector.broadcast %cst_27 : f32 to vector<16x128xf32>
    %60 = arith.mulf %59, %6 : vector<16x128xf32>
    %61 = arith.subf %58, %60 : vector<16x128xf32>
    %62 = math.absf %61 : vector<16x128xf32>
    %cst_28 = arith.constant dense<0xFF800000> : vector<16xf32>
    %63 = vector.multi_reduction <maximumf>, %62, %cst_28 [1] : vector<16x128xf32> to vector<16xf32>
    %64 = vector.shape_cast %63 : vector<16xf32> to vector<16x1xf32>
    %cst_29 = arith.constant dense<0xFF800000> : vector<1xf32>
    %65 = vector.multi_reduction <maximumf>, %64, %cst_29 [0] : vector<16x1xf32> to vector<1xf32>
    %66 = vector.shape_cast %65 : vector<1xf32> to vector<1x1xf32>
    %67 = arith.subf %35, %62 : vector<16x128xf32>
    %68 = math.absf %67 : vector<16x128xf32>
    %69 = arith.mulf %68, %62 : vector<16x128xf32>
    %cst_30 = arith.constant dense<0.000000e+00> : vector<16xf32>
    %70 = vector.multi_reduction <add>, %69, %cst_30 [1] : vector<16x128xf32> to vector<16xf32>
    %71 = vector.shape_cast %70 : vector<16xf32> to vector<16x1xf32>
    %cst_31 = arith.constant dense<0.000000e+00> : vector<1xf32>
    %72 = vector.multi_reduction <add>, %71, %cst_31 [0] : vector<16x1xf32> to vector<1xf32>
    %73 = vector.shape_cast %72 : vector<1xf32> to vector<1x1xf32>
    %c0_32 = arith.constant 0 : index
    %c0_33 = arith.constant 0 : index
    %74 = vector.load %arg3[%c0_32, %c0_33] : memref<1x1xf32, #tpu.memory_space<vmem>>, vector<1x1xf32>
    %cst_34 = arith.constant 9.99999997E-7 : f32
    %75 = vector.broadcast %cst_34 : f32 to vector<1x1xf32>
    %76 = arith.addf %66, %75 : vector<1x1xf32>
    %77 = arith.divf %73, %76 : vector<1x1xf32>
    %78 = arith.addf %74, %77 : vector<1x1xf32>
    %c0_35 = arith.constant 0 : index
    %c0_36 = arith.constant 0 : index
    %79 = vector.load %arg3[%c0_35, %c0_36] : memref<1x1xf32, #tpu.memory_space<vmem>>, vector<1x1xf32>
    tpu.vector_store %arg3[%c0_35, %c0_36], %78 {strides = array<i32>} : memref<1x1xf32, #tpu.memory_space<vmem>>, vector<1x1xf32>,
    return
  }
  func.func @transform_0(%arg0: i32) -> (i32, i32, i32) {
    %c0_i32 = arith.constant 0 : i32
    %c0_i32_0 = arith.constant 0 : i32
    %c0_i32_1 = arith.constant 0 : i32
    return %arg0, %c0_i32, %c0_i32_0 : i32, i32, i32
  }
  func.func @transform_1(%arg0: i32) -> (i32, i32, i32) {
    %c0_i32 = arith.constant 0 : i32
    %c0_i32_0 = arith.constant 0 : i32
    %c0_i32_1 = arith.constant 0 : i32
    return %arg0, %c0_i32, %c0_i32_0 : i32, i32, i32
  }
  func.func @transform_2(%arg0: i32) -> (i32, i32) {
    %c0_i32 = arith.constant 0 : i32
    %c0_i32_0 = arith.constant 0 : i32
    %c0_i32_1 = arith.constant 0 : i32
    return %c0_i32, %c0_i32_0 : i32, i32
  }
}

</mosaic_0001>

<bundles_post_ra>
// kernel: tpu_custom_call.1
= control target key start
LH: loop header
LB: loop body
LE: loop exit
PB: predicated region body
PF: predicated region fallthrough
CT: control target
= control target key end

     0   :  { %7 = vsyncpa [#allocation3], 0  ;;  %s839_s0 = inlined_call_operand.hbm [shape: f32[2,16,128], index: 0, kind: input, shape index: {}]   ;;  %s840_s1 = inlined_call_operand.hbm [shape: f32[2,16,128], index: 1, kind: input, shape index: {}]   ;;  %s841_s2 = inlined_call_operand.hbm [shape: f32[1,1], index: 2, kind: output, shape index: {}]  }
   0x1   :  { %9 = vsyncpa [#allocation3 + $0x1], 0 }
   0x2   :  { %10 = vsyncpa [#allocation6], 0 }
   0x3   :  { %12 = vsyncpa [#allocation6 + $0x1], 0 }
   0x4   :  { %13 = vsyncpa [#allocation4], 0  ;;  %s630_s9 = smov 0   ;;  %s632_s10 = smov 0  }
   0x5   :  { %s634_s11 = smov 0   ;;  %s636_s12 = smov 0  }
   0x6 LB: > { %s649_s13 = sadd.s32 4294967295, %s605_s12   ;;  %s652_s14 = sadd.s32 1, %s605_s12   ;;  %s605_s12 = sphi %s636_s12, %s851_s12   ;;  %s601_s11 = sphi %s634_s11, %s850_s11   ;;  %s597_s10 = sphi %s632_s10, %s849_s10   ;;  %s593_s9 = sphi %s630_s9, %s848_s9  }
   0x7   : > { %s23_s15 = ssub.s32 %s605_s12, %s652_s14  ;;  %s26_s16 = sadd.s32 1, %s601_s11 }
   0x8   : > { %p24_p0 = scmp.eq.s32.totalorder %s23_s15, 0  ;;  %p33_p1 = scmp.ne.s32.totalorder %s601_s11, %s597_s10 }
   0x9   : > { %p34_p2 = scmp.eq.s32.totalorder %s605_s12, 0  ;;  %p39_p3 = scmp.ne.s32.totalorder %s597_s10, %s593_s9 }
   0xa   : > { %s662_s17 = scalar_select %p24_p0, %s601_s11, %s26_s16  }
   0xb   : > { %p35_p4 = por %p34_p2, %p33_p1  ;;  %p40_p5 = scmp.eq.s32.totalorder %s649_s13, 0 }
   0xc   : > { %p434_p6 = scmp.lt.s32.totalorder %s605_s12, 2  ;;  %s671_s19 = sand.u32 1, %s601_s11  }
   0xd   : > { %p666_p7 = por %p40_p5, %p39_p3  ;;  %s403_s20 = sshll.u32 %s671_s19, 4 }
   0xe   : > { %s417_s21 = sshll.u32 %s605_s12, 8  ;;  %s114_s25 = scalar_lea.vmem [#allocation2], %s403_s20 }
   0xf   : > { %s843_s18 = scalar_select %p666_p7, 1, 0 }
  0x10   : > { %s680_s24 = scalar_lea.hbm %s839_s0, %s417_s21  ;;  %s121_s26 = sshll.u32 %s114_s25, 4  ;;  %s684_s26 = int_to_ptr.vmem [resolvable:$true] %s121_s26 }
  0x11   : > { %p686_p8 = pnand %p434_p6, %p35_p4  ;;  %s111_s28 = scalar_lea.sflag [#allocation3], %s671_s19 }
  0x12   : > { %s477_s29 = scalar_lea.hbm %s680_s24, 256  ;;  %s482_s4 = scalar_lea.hbm %s839_s0, 512 }
  0x13   : > { %p478_p10 = scmp.ne.s32.totalorder %s680_s24, %s477_s29  ;;  %p479_p11 = pneg %p686_p8 }
  0x14   : > { %p483_p0 = scmp.lt.u32.totalorder %s680_s24, %s839_s0  ;;  %p484_p1 = scmp.lt.u32.totalorder %s482_s4, %s477_s29 }
  0x15   : > { %p480_p12 = pnand %p479_p11, %p478_p10  ;;  %p486_p3 = scmp.lt.u32.totalorder %s477_s29, %s680_s24 }
  0x16   : > { %p485_p2 = por %p484_p1, %p483_p0 }
  0x17   : > { %p481_p13 = pneg %p480_p12 }
  0x18   : > { %p487_p4 = por %p486_p3, %p485_p2 }
  0x1a   : > { %p488_p5 = pnand %p487_p4, %p481_p13 }
  0x1c   : > { %491 = shalt.err (!%p488_p5)
}
  0x1d   : > { %s492_s7 = scalar_lea.vmem %s684_s26, 256  ;;  %s607_s8 = smov [#allocation2]  }
  0x1e   : > { %p493_p6 = scmp.ne.s32.totalorder %s684_s26, %s492_s7  ;;  %s497_s9 = sshll.u32 %s607_s8, 4  ;;  %s498_s9 = int_to_ptr.vmem [resolvable:$false] %s497_s9 }
  0x1f   : > { %s499_s15 = scalar_lea.vmem %s498_s9, 512  ;;  %p500_p9 = scmp.lt.s32.totalorder %s684_s26, %s498_s9 }
  0x20   : > { %p495_p10 = pnand %p493_p6, %p479_p11  ;;  %p501_p0 = scmp.lt.s32.totalorder %s499_s15, %s492_s7 }
  0x22   : > { %p496_p12 = pneg %p495_p10  ;;  %p502_p1 = por %p501_p0, %p500_p9 }
  0x24   : > { %p503_p2 = pnand %p502_p1, %p496_p12 }
  0x26   : > { %506 = shalt.err (!%p503_p2)
}
  0x27   : > { %s608_s16 = smov 128   ;;  %s609_s22 = smov 8  }
  0x28   : > { %430 = dma.hbm_to_vmem [thread:$0]  (!%p686_p8), %s680_s24, 256, %s684_s26, %s111_s28, %s608_s16, %s608_s16, %s609_s22  }
  0x29   : > { %p150_p9 = scmp.lt.s32.totalorder %s605_s12, 3  ;;  %s728_s29 = scalar_lea.hbm %s840_s1, %s417_s21 }
  0x2a   : > { %p845_p13 = scmp.ge.s32.totalorder %s605_s12, 1  ;;  %s135_s3 = scalar_lea.vmem [#allocation5], %s403_s20 }
  0x2b   : > { %s142_s4 = sshll.u32 %s135_s3, 4  ;;  %s132_s24 = scalar_lea.sflag [#allocation6], %s671_s19  ;;  %s738_s4 = int_to_ptr.vmem [resolvable:$true] %s142_s4 }
  0x2c   : > { %p732_p3 = pnand %p845_p13, %p150_p9  ;;  %s507_s26 = scalar_lea.hbm %s728_s29, 256 }
  0x2d   : > { %p508_p4 = scmp.ne.s32.totalorder %s728_s29, %s507_s26  ;;  %s512_s28 = scalar_lea.hbm %s840_s1, 512 }
  0x2e   : > { %p513_p10 = scmp.lt.u32.totalorder %s728_s29, %s840_s1  ;;  %p514_p12 = scmp.lt.u32.totalorder %s512_s28, %s507_s26 }
  0x2f   : > { %p510_p5 = pnand %p508_p4, %p479_p11  ;;  %p516_p1 = scmp.lt.u32.totalorder %s507_s26, %s728_s29 }
  0x30   : > { %p515_p0 = por %p514_p12, %p513_p10 }
  0x31   : > { %p511_p6 = pneg %p510_p5 }
  0x32   : > { %p517_p2 = por %p516_p1, %p515_p0 }
  0x34   : > { %p518_p9 = pnand %p517_p2, %p511_p6 }
  0x36   : > { %521 = shalt.err (!%p518_p9)
}
  0x37   : > { %s522_s20 = scalar_lea.vmem %s738_s4, 256  ;;  %s610_s7 = smov [#allocation5]  }
  0x38   : > { %p523_p13 = scmp.ne.s32.totalorder %s738_s4, %s522_s20  ;;  %s527_s8 = sshll.u32 %s610_s7, 4  ;;  %s528_s8 = int_to_ptr.vmem [resolvable:$false] %s527_s8 }
  0x39   : > { %s529_s9 = scalar_lea.vmem %s528_s8, 512  ;;  %p530_p7 = scmp.lt.s32.totalorder %s738_s4, %s528_s8 }
  0x3a   : > { %p525_p4 = pnand %p523_p13, %p479_p11  ;;  %p531_p10 = scmp.lt.s32.totalorder %s529_s9, %s522_s20 }
  0x3c   : > { %p526_p5 = pneg %p525_p4  ;;  %p532_p12 = por %p531_p10, %p530_p7 }
  0x3e   : > { %p533_p0 = pnand %p532_p12, %p526_p5 }
  0x40   : > { %536 = shalt.err (!%p533_p0)
}
  0x41   : > { %433 = dma.hbm_to_vmem [thread:$0]  (!%p686_p8), %s728_s29, 256, %s738_s4, %s132_s24, %s608_s16, %s608_s16, %s609_s22  }
  0x42   : > { %154 = sbr.rel (%p732_p3) target bundleno = 405 (0x195), region = 28  ;;  %s156_s15 = sand.u32 (!%p732_p3), 1, %s597_s10  }
  0x43   : > { %s410_s23 = sshll.u32 (!%p732_p3), %s156_s15, 4  ;;  %s157_s25 = scalar_lea.sflag (!%p732_p3), [#allocation3], %s156_s15 }
  0x44   : > { %s160_s3 = scalar_lea.vmem (!%p732_p3), [#allocation2], %s410_s23  ;;  %p847_p7 = scmp.ne.s32.totalorder (!%p732_p3), %s843_s18, 0 }
  0x49   : > { %580 = dma.done.wait (%p847_p7), %s157_s25, 256  }
  0x4a   : > { %582 = vsyncadd (%p847_p7), %s157_s25, 4294967040  ;;  %s166_s27 = scalar_lea.sflag [#allocation6], %s156_s15  ;;  %s169_s19 = scalar_lea.vmem [#allocation5], %s410_s23 }
  0x4b   : > { %584 = dma.done.wait (%p847_p7), %s166_s27, 256  }
  0x4c   : > { %586 = vsyncadd (%p847_p7), %s166_s27, 4294967040  ;;  %p412_p8 = scmp.ne.s32.totalorder %s649_s13, 0 }
  0x4d   : > { %vm194_vm0 = vcmask (!%p412_p8), 0   ;;  %v611_v0 = vmov (!%p412_p8), 0.0  }
  0x4e   : > { %193 = sbr.rel (%p412_p8) target bundleno = 85 (0x55), region = 40  ;;  %195 = vst.msk [vmem:[#allocation7] sm:$0x1] (!%p412_p8), %vm194_vm0, %v611_v0 }
  0x55 PF: > { %v198_v1 = vld [vmem:[%s169_s19] sm:$0xff]  ;;  %v199_v2 = vld [vmem:[%s169_s19 + $0x8] sm:$0xff]  ;;  %v200_v3 = vlaneseq  ;;  %s612_s16 = smov 127   ;;  %s613_s22 = smov 1   ;;  %vm318_vm7 = vcmask 0  }
  0x56   : > { %267 = vrot.lane.b32.xlu1 %v198_v1, %s612_s16  ;;  %261 = vrot.lane.b32.xlu0 %v198_v1, %s613_s22  ;;  %v250_v4 = vrot.slane %v199_v2, 7  ;;  %v256_v5 = vrot.slane %v199_v2, 1  ;;  %v249_v6 = vrot.slane %v198_v1, 7  ;;  %v255_v7 = vrot.slane %v198_v1, 1  ;;  %v197_v8 = vld [vmem:[%s160_s3 + $0x8] sm:$0xff]  ;;  %v196_v9 = vld [vmem:[%s160_s3] sm:$0xff] }
  0x57   : > { %v201_v10 = vshrl.u32 %v200_v3, 7  ;;  %v205_v11 = vrot.slane %v196_v9, 7  ;;  %v206_v12 = vrot.slane %v197_v8, 7  ;;  %v214_v13 = vrot.slane %v196_v9, 1  ;;  %s614_s18 = smov [#allocation7]   ;;  %p435_p11 = scmp.eq.s32.totalorder %s649_s13, 1 }
  0x58   : > { %v215_v14 = vrot.slane %v197_v8, 1  ;;  %v204_v32 = vand.u32 127, %v200_v3  ;;  %v279_v38 = vmul.f32 4.0, %v198_v1  ;;  %v280_v46 = vmul.f32 4.0, %v199_v2  ;;  %s327_s29 = sshll.u32 %s614_s18, 4  ;;  %s328_s29 = int_to_ptr.vmem [resolvable:$true] %s327_s29 }
  0x59   : > { %vm207_vm1 = vcmp.lt.s32.totalorder %v201_v10, 1  ;;  %vm210_vm2 = vcmp.ge.s32.totalorder %v201_v10, 1  ;;  %vm216_vm3 = vcmp.lt.s32.totalorder %v201_v10, 7  ;;  %v202_v17 = vadd.s32 8, %v201_v10  ;;  %s537_s30 = scalar_lea.vmem %s328_s29, 16  ;;  %s543_s4 = scalar_lea.vmem %s328_s29, 32 }
  0x5a   : > { %269 = vrot.lane.b32.xlu1 %v199_v2, %s612_s16  ;;  %263 = vrot.lane.b32.xlu0 %v199_v2, %s613_s22  ;;  %v252_v15 = vsel %vm207_vm1, %v250_v4, %v249_v6  ;;  %v257_v16 = vsel %vm216_vm3, %v255_v7, %v256_v5  ;;  %v251_v19 = vsel %vm207_vm1, %v249_v6, %v250_v4  ;;  %vm234_vm5 = vcmp.lt.s32.totalorder %v204_v32, 127  ;;  %p538_p3 = scmp.ne.s32.totalorder %s328_s29, %s537_s30  ;;  %p544_p2 = scmp.lt.s32.totalorder %s328_s29, %s328_s29 }
  0x5b   : > { %v253_v18 = vsel %vm210_vm2, %v252_v15, 0.0  ;;  %v258_v20 = vsel %vm216_vm3, %v256_v5, %v255_v7  ;;  %v208_v21 = vsel %vm207_vm1, %v205_v11, %v206_v12  ;;  %vm220_vm4 = vcmp.lt.s32.totalorder %v202_v17, 15  ;;  %p545_p9 = scmp.lt.s32.totalorder %s543_s4, %s537_s30 }
  0x5c   : > { %v273_v22 = vadd.f32 %v257_v16, %v253_v18  ;;  %v218_v23 = vsel %vm216_vm3, %v215_v14, %v214_v13  ;;  %v209_v24 = vsel %vm207_vm1, %v206_v12, %v205_v11  ;;  %v260_v25 = vsel %vm220_vm4, %v258_v20, 0.0  ;;  %p539_p6 = pnand %p538_p3, %p435_p11 }
  0x5d   : > { %v222_v26 = vsel %vm220_vm4, %v218_v23, 0.0  ;;  %v212_v27 = vsel %vm210_vm2, %v209_v24, 0.0  ;;  %v217_v28 = vsel %vm216_vm3, %v214_v13, %v215_v14  ;;  %v274_v29 = vadd.f32 %v260_v25, %v251_v19  ;;  %p546_p13 = por %p545_p9, %p544_p2 }
  0x5e   : > { %225 = vrot.lane.b32.xlu1 %v197_v8, %s613_s22  ;;  %223 = vrot.lane.b32.xlu0 %v196_v9, %s613_s22  ;;  %v238_v30 = vadd.f32 %v222_v26, %v208_v21  ;;  %v237_v31 = vadd.f32 %v217_v28, %v212_v27  ;;  %vm227_vm6 = vcmp.ge.s32.totalorder %v204_v32, 1  ;;  %v244_v57 = vmul.f32 4.0, %v197_v8  ;;  %p540_p1 = pneg %p539_p6 }
  0x5f   : > { %v243_v59 = vmul.f32 4.0, %v196_v9 }
  0x60   : > { %p547_p4 = pnand %p546_p13, %p540_p1 }
  0x62   : > { %232 = vrot.lane.b32.xlu1 %v197_v8, %s612_s16  ;;  %230 = vrot.lane.b32.xlu0 %v196_v9, %s612_s16 }
  0xc8   : > { %v268_v33 = vpop.permute.xlu1 %267  ;;  %v262_v34 = vpop.permute.xlu0 %261 }
  0xc9   : > { %v271_v35 = vsel %vm234_vm5, %v268_v33, 0.0  ;;  %v265_v36 = vsel %vm227_vm6, %v262_v34, 0.0 }
  0xca   : > { %v275_v37 = vadd.f32 %v273_v22, %v265_v36 }
  0xcc   : > { %v277_v39 = vadd.f32 %v275_v37, %v271_v35  ;;  %v270_v40 = vpop.permute.xlu1 %269  ;;  %v264_v41 = vpop.permute.xlu0 %263 }
  0xcd   : > { %v272_v42 = vsel %vm234_vm5, %v270_v40, 0.0  ;;  %v266_v43 = vsel %vm227_vm6, %v264_v41, 0.0 }
  0xce   : > { %v276_v44 = vadd.f32 %v274_v29, %v266_v43  ;;  %v281_v45 = vsub.f32 %v277_v39, %v279_v38 }
  0xd0   : > { %v278_v47 = vadd.f32 %v276_v44, %v272_v42  ;;  %v226_v48 = vpop.permute.xlu1 %225  ;;  %v224_v49 = vpop.permute.xlu0 %223  ;;  %v283_v50 = vand.u32 2147483647, %v281_v45 }
  0xd1   : > { %v229_v51 = vsel %vm227_vm6, %v226_v48, 0.0  ;;  %v228_v52 = vsel %vm227_vm6, %v224_v49, 0.0 }
  0xd2   : > { %v240_v53 = vadd.f32 %v238_v30, %v229_v51  ;;  %285 = vmax.xlane.f32.xlu0 %v283_v50  ;;  %v282_v54 = vsub.f32 %v278_v47, %v280_v46  ;;  %v239_v55 = vadd.f32 %v237_v31, %v228_v52  ;;  %v313_v31 = vld [vmem:[#allocation7] sm:$0x1] }
  0xd4   : > { %v233_v56 = vpop.permute.xlu1 %232  ;;  %v231_v58 = vpop.permute.xlu0 %230  ;;  %v284_v60 = vand.u32 2147483647, %v282_v54 }
  0xd5   : > { %v236_v61 = vsel %vm234_vm5, %v233_v56, 0.0  ;;  %v235_v62 = vsel %vm234_vm5, %v231_v58, 0.0 }
  0xd6   : > { %v242_v63 = vadd.f32 %v240_v53, %v236_v61  ;;  %v241_v0 = vadd.f32 %v239_v55, %v235_v62  ;;  %287 = vmax.xlane.f32.xlu1 %v284_v60 }
  0xd8   : > { %v246_v1 = vsub.f32 %v242_v63, %v244_v57  ;;  %v245_v2 = vsub.f32 %v241_v0, %v243_v59 }
  0xda   : > { %v248_v3 = vand.u32 2147483647, %v246_v1  ;;  %v247_v4 = vand.u32 2147483647, %v245_v2 }
  0xdc   : > { %v296_v5 = vsub.f32 %v247_v4, %v283_v50  ;;  %v297_v6 = vsub.f32 %v248_v3, %v284_v60 }
  0xde   : > { %v298_v7 = vand.u32 2147483647, %v296_v5  ;;  %v299_v10 = vand.u32 2147483647, %v297_v6 }
  0xe0   : > { %v300_v11 = vmul.f32 %v298_v7, %v283_v50  ;;  %v301_v8 = vmul.f32 %v299_v10, %v284_v60 }
  0xe2   : > { %302 = vadd.xlane.f32.xlu0 %v300_v11 }
  0xe6   : > { %304 = vadd.xlane.f32.xlu0 %v301_v8 }
 0x15f   : > { %v286_v9 = vpop.xlane.xlu0 %285 }
 0x163   : > { %v288_v12 = vpop.xlane.xlu1 %287 }
 0x164   : > { %v289_v13 = vmax.f32 %v286_v9, %v288_v12 }
 0x166   : > { %v290_v14 = vrot.slane %v289_v13, 4 }
 0x168   : > { %v291_v15 = vmax.f32 %v289_v13, %v290_v14 }
 0x16a   : > { %v292_v16 = vrot.slane %v291_v15, 2 }
 0x16c   : > { %v293_v17 = vmax.f32 %v291_v15, %v292_v16 }
 0x16e   : > { %v294_v18 = vrot.slane %v293_v17, 1 }
 0x16f   : > { %v303_v19 = vpop.xlane.xlu0 %302 }
 0x170   : > { %v295_v20 = vmax.f32 %v293_v17, %v294_v18 }
 0x172   : > { %v314_v21 = vadd.f32 1e-06, %v295_v20 }
 0x173   : > { %v305_v22 = vpop.xlane.xlu0 %304 }
 0x174   : > { %v306_v23 = vadd.f32 %v305_v22, %v303_v19  ;;  %475 = vrcp.f32 %v314_v21 }
 0x176   : > { %v307_v24 = vrot.slane %v306_v23, 4 }
 0x178   : > { %v308_v25 = vadd.f32 %v307_v24, %v306_v23 }
 0x17a   : > { %v309_v26 = vrot.slane %v308_v25, 2 }
 0x17c   : > { %v310_v27 = vadd.f32 %v309_v26, %v308_v25 }
 0x17e   : > { %v311_v28 = vrot.slane %v310_v27, 1  ;;  %v476_v30 = vpop.eup %475 }
 0x180   : > { %v312_v29 = vadd.f32 %v311_v28, %v310_v27 }
 0x182   : > { %v316_v32 = vmul.f32 %v476_v30, %v312_v29 }
 0x184   : > { %v317_v33 = vadd.f32 %v316_v32, %v313_v31 }
 0x186   : > { %319 = vst.msk [vmem:[#allocation7] sm:$0x1] %vm318_vm7, %v317_v33 }
 0x187   : > { %550 = shalt.err (!%p547_p4)
}
 0x188   : > { %s551_s12 = scalar_lea.hbm %s841_s2, 16 }
 0x189   : > { %p552_p5 = scmp.ne.s32.totalorder %s841_s2, %s551_s12  ;;  %p557_p0 = scmp.lt.u32.totalorder %s551_s12, %s841_s2 }
 0x18b   : > { %p553_p10 = pnand %p552_p5, %p435_p11 }
 0x18d   : > { %p554_p12 = pneg %p553_p10 }
 0x18f   : > { %p559_p7 = pnand %p557_p0, %p554_p12 }
 0x191   : > { %562 = shalt.err (!%p559_p7)
}
 0x192   : > { %424 = dma.vmem_to_hbm [thread:$0]  (%p435_p11), %s328_s29, 16, %s841_s2, [#allocation4]  }
 0x193   : > { %588 = dma.done.wait (%p435_p11), [#allocation4], 16  }
 0x194   : > { %590 = vsyncadd (%p435_p11), [#allocation4], 4294967280 }
 0x195 PF: > { %p16_p8 = scmp.ge.s32.totalorder %s652_s14, 4   ;;  %s848_s9 = smov %s597_s10 }
 0x196   : > { %s849_s10 = smov %s601_s11  ;;  %s850_s11 = smov %s662_s17 }
 0x197   : > { %s851_s12 = smov %s652_s14  ;;  %18 = sbr.rel (!%p16_p8) target bundleno = 6 (0x6), region = 82 }
 0x19e   :  { %340 = vsyncpa [#allocation3], 1 }
 0x19f   :  { %342 = vsyncpa [#allocation3 + $0x1], 1 }
 0x1a0   :  { %343 = vsyncpa [#allocation6], 1 }
 0x1a1   :  { %345 = vsyncpa [#allocation6 + $0x1], 1 }
 0x1a2   :  { %346 = vsyncpa [#allocation4], 1 }
 0x1a3   :  { %348 = vsyncpa [#allocation4 + $0x1], 1 }

</bundles_post_ra>
